<compile_context>
chip_gen: v7x
topology: tpu7x:2x2x1
jax: 0.10.0
libtpu: 0.0.40
codegen_flags: <defaults>
</compile_context>

<pallas_src>
import functools

import jax
import jax.numpy as jnp
from jax.experimental import pallas as pl
from jax.experimental.pallas import tpu as pltpu

LEAKY_SLOPE = 0.01  # nn.LeakyReLU() default negative_slope


def _leaky_relu(x):
    return jnp.where(x > 0, x, LEAKY_SLOPE * x)


def _round_up(x, m):
    return ((x + m - 1) // m) * m


def _choose_batch_tile(B, cap=4096):
    """Pick the batch tile TB.

    * Tiny batches: one grid step, TB == B (block dims equal array dims, so the
      (8,128) layout rule is satisfied regardless of B).
    * Larger batches: TB is a multiple of 128 (lane-dense transposed output
      block) and chosen so the grid has >= 2 steps (v7x dual-TensorCore), capped
      at `cap` so double-buffered tiles stay well inside v5e's scoped VMEM.
    """
    if B <= 128:
        return B
    tb = _round_up(pl.cdiv(B, 2), 128)
    return min(cap, tb)


def critic_kernel(s_ref, a_ref, w_ref, b_ref, o_ref, *, S, A, H1, H2, OUT):
    """Fused 3-layer MLP on one batch tile.

    s_ref: (TB, S) f32   a_ref: (TB, A) f32
    w_ref: packed bf16 weight slab, rows = [W1s | W1a | W2 | W3^T]
    b_ref: (3, maxW) f32 packed biases
    o_ref: (OUT, TB) f32 transposed, lane-dense output block
    """
    c = w_ref.dtype                                   # mxu dtype (bf16)
    b = b_ref[...]                                    # (3, maxW) f32

    r1 = S + A
    r2 = r1 + H1
    w1s = w_ref[0:S, :H1]                             # (S, H1)  bf16
    w1a = w_ref[S:r1, :H1]                            # (A, H1)  bf16
    w2 = w_ref[r1:r2, :H2]                            # (H1, H2) bf16
    w3t = w_ref[r2:r2 + OUT, :H2]                     # (OUT, H2) bf16 (pre-transposed)

    # Layer 1: state @ W1s + action @ W1a  ==  concat(state, action) @ W1.
    h = jnp.dot(s_ref[...].astype(c), w1s, preferred_element_type=jnp.float32)
    h = h + jnp.dot(a_ref[...].astype(c), w1a, preferred_element_type=jnp.float32)
    h = _leaky_relu(h + b[0:1, :H1])                  # f32 VPU epilogue

    # Layer 2.
    h = jnp.dot(h.astype(c), w2, preferred_element_type=jnp.float32)
    h = _leaky_relu(h + b[1:2, :H2])                  # (TB, H2) f32

    # Layer 3, lane-dense: y^T = W3^T @ h^T  -> (OUT, TB), batch along lanes.
    h_t = jnp.transpose(h).astype(c)                  # (H2, TB) via XLU, then cast
    y_t = jnp.dot(w3t, h_t, preferred_element_type=jnp.float32)   # (OUT, TB)
    # OUT == 1 (asserted in the wrapper), so the (1,1) bias broadcasts correctly.
    o_ref[...] = (y_t + b[2:3, 0:1]).astype(o_ref.dtype)


def critic_forward(state, action, params, *, batch_tile_cap=4096):
    """state: (B, S), action: (B, A) -> (B, 1). One fused pallas_call."""
    w, b = params["w"], params["b"]
    S_, A_, H1, H2, OUT = params["dims"]
    B, S = state.shape
    A = action.shape[1]
    assert (S, A) == (S_, A_), "input dims do not match params"
    assert OUT == 1, "fused lane-dense kernel assumes output_dim == 1"

    TB = _choose_batch_tile(B, batch_tile_cap)
    grid = (pl.cdiv(B, TB),)

    kernel = functools.partial(critic_kernel, S=S, A=A, H1=H1, H2=H2, OUT=OUT)

    flops = 2 * B * ((S + A) * H1 + H1 * H2 + H2 * OUT)
    bytes_accessed = (B * (S + A) * 4                       # f32 activations in
                      + B * OUT * 4                         # f32 output
                      + w.size * w.dtype.itemsize           # bf16 weight slab
                      + b.size * 4)                         # f32 bias slab

    out_t = pl.pallas_call(
        kernel,
        out_shape=jax.ShapeDtypeStruct((OUT, B), jnp.float32),
        grid=grid,
        in_specs=[
            pl.BlockSpec((TB, S), lambda i: (i, 0)),         # state batch tile
            pl.BlockSpec((TB, A), lambda i: (i, 0)),         # action batch tile
            pl.BlockSpec(w.shape, lambda i: (0, 0)),         # packed weight slab (resident)
            pl.BlockSpec(b.shape, lambda i: (0, 0)),         # packed biases (resident)
        ],
        out_specs=pl.BlockSpec((OUT, TB), lambda i: (0, i)), # lane-dense transposed output
        compiler_params=pltpu.CompilerParams(
            # Batch tiles are independent -> shard across TensorCores (v7x/megacore).
            dimension_semantics=("parallel",),
            # Raise v5e's 16 MiB default; harmless on v6e/v7x.
            vmem_limit_bytes=32 * 1024 * 1024,
        ),
        cost_estimate=pl.CostEstimate(
            flops=flops, transcendentals=0, bytes_accessed=bytes_accessed),
    )(state, action, w, b)

    return out_t.reshape(B, OUT)


def init_critic_params(key, state_dim, action_dim, output_dim=1, hidden=(64, 64),
                       mxu_dtype=jnp.bfloat16):
    """PyTorch nn.Linear default init: U(-1/sqrt(fan_in), 1/sqrt(fan_in)) for
    weight and bias. Weights are stored (in_dim, out_dim), pre-split at the
    state/action boundary, W3 pre-transposed, everything packed into ONE bf16
    slab; the three biases go into one f32 slab."""
    h1, h2 = hidden
    dims_in = [state_dim + action_dim, h1, h2]
    dims_out = [h1, h2, output_dim]
    ws, bs = [], []
    for in_dim, out_dim in zip(dims_in, dims_out):
        key, kw, kb = jax.random.split(key, 3)
        bound = 1.0 / (in_dim ** 0.5)
        ws.append(jax.random.uniform(kw, (in_dim, out_dim), jnp.float32, -bound, bound))
        bs.append(jax.random.uniform(kb, (out_dim,), jnp.float32, -bound, bound))
    w1, w2, w3 = ws

    maxw = max(h1, h2)
    rows = state_dim + action_dim + h1 + output_dim
    slab = jnp.zeros((rows, maxw), jnp.float32)
    r1 = state_dim + action_dim
    slab = slab.at[0:state_dim, :h1].set(w1[:state_dim])        # W1 (state rows)
    slab = slab.at[state_dim:r1, :h1].set(w1[state_dim:])       # W1 (action rows)
    slab = slab.at[r1:r1 + h1, :h2].set(w2)                     # W2
    slab = slab.at[r1 + h1:r1 + h1 + output_dim, :h2].set(w3.T)  # W3^T
    w_slab = slab.astype(mxu_dtype)                              # pre-cast once

    b_slab = jnp.zeros((3, maxw), jnp.float32)
    b_slab = b_slab.at[0, :h1].set(bs[0])
    b_slab = b_slab.at[1, :h2].set(bs[1])
    b_slab = b_slab.at[2, :output_dim].set(bs[2])

    return {"w": w_slab, "b": b_slab,
            "dims": (state_dim, action_dim, h1, h2, output_dim)}


def critic_reference(state, action, params):
    """Pure-JAX reference doing the identical math (same bf16 weights/casts)."""
    w, b = params["w"], params["b"]
    S, A, H1, H2, OUT = params["dims"]
    c = w.dtype
    r1, r2 = S + A, S + A + H1
    w1s, w1a = w[0:S, :H1], w[S:r1, :H1]
    w2, w3t = w[r1:r2, :H2], w[r2:r2 + OUT, :H2]
    h = (jnp.dot(state.astype(c), w1s, preferred_element_type=jnp.float32)
         + jnp.dot(action.astype(c), w1a, preferred_element_type=jnp.float32))
    h = _leaky_relu(h + b[0:1, :H1])
    h = jnp.dot(h.astype(c), w2, preferred_element_type=jnp.float32)
    h = _leaky_relu(h + b[1:2, :H2])
    y = jnp.dot(h.astype(c), w3t.T, preferred_element_type=jnp.float32)
    return y + b[2:3, :OUT]


if __name__ == "__main__":
    STATE_DIM, ACTION_DIM = 16, 16
    key = jax.random.PRNGKey(0)
    k_params, k_s1, k_a1, k_s2, k_a2 = jax.random.split(key, 5)
    params = init_critic_params(k_params, STATE_DIM, ACTION_DIM)

    # Case 1: tiny inference batch (single grid step, block == full batch).
    B1 = 8
    s1 = jax.random.normal(k_s1, (B1, STATE_DIM), jnp.float32)
    a1 = jax.random.normal(k_a1, (B1, ACTION_DIM), jnp.float32)
    out1 = jax.block_until_ready(critic_forward(s1, a1, params))
    ref1 = critic_reference(s1, a1, params)
    assert out1.shape == (B1, 1), out1.shape
    assert jnp.allclose(out1, ref1, atol=1e-2, rtol=1e-2), (out1, ref1)

    # Case 2: training-size batch -> grid of 2 "parallel" 256-row tiles
    # (>= 2 steps so both v7x TensorCores engage; tiles are multiples of 128).
    B2 = 512
    s2 = jax.random.normal(k_s2, (B2, STATE_DIM), jnp.float32)
    a2 = jax.random.normal(k_a2, (B2, ACTION_DIM), jnp.float32)
    out2 = jax.block_until_ready(critic_forward(s2, a2, params))
    ref2 = critic_reference(s2, a2, params)
    assert out2.shape == (B2, 1), out2.shape
    assert jnp.allclose(out2, ref2, atol=1e-2, rtol=1e-2), (out2, ref2)

    print("KERNEL_OK")
</pallas_src>

<mosaic_0001>
module attributes {stable_mosaic.version = 11 : i64} {
  func.func @critic_kernel(%arg0: i32, %arg1: memref<8x16xf32, #tpu.memory_space<vmem>>, %arg2: memref<8x16xf32, #tpu.memory_space<vmem>>, %arg3: memref<97x64xbf16, #tpu.memory_space<vmem>>, %arg4: memref<3x64xf32, #tpu.memory_space<vmem>>, %arg5: memref<1x8xf32, #tpu.memory_space<vmem>>) attributes {dimension_semantics = [#tpu.dimension_semantics<parallel>], iteration_bounds = array<i64: 1>, scalar_prefetch = 0 : i64, scratch_operands = 0 : i64, tpu.core_type = #tpu.core_type<tc>, window_params = [{transform_indices = @transform_0, window_bounds = array<i64: 8, 16>}, {transform_indices = @transform_1, window_bounds = array<i64: 8, 16>}, {pipeline_mode = #tpu.pipeline_mode<synchronous>, transform_indices = @transform_2, window_bounds = array<i64: 97, 64>}, {pipeline_mode = #tpu.pipeline_mode<synchronous>, transform_indices = @transform_3, window_bounds = array<i64: 3, 64>}, {transform_indices = @transform_4, window_bounds = array<i64: 1, 8>}]} {
    %c0 = arith.constant 0 : index
    %c0_0 = arith.constant 0 : index
    %0 = vector.load %arg4[%c0, %c0_0] : memref<3x64xf32, #tpu.memory_space<vmem>>, vector<3x64xf32>
    %c0_1 = arith.constant 0 : index
    %c0_2 = arith.constant 0 : index
    %1 = vector.load %arg3[%c0_1, %c0_2] : memref<97x64xbf16, #tpu.memory_space<vmem>>, vector<16x64xbf16>
    %c16 = arith.constant 16 : index
    %c0_3 = arith.constant 0 : index
    %2 = vector.load %arg3[%c16, %c0_3] : memref<97x64xbf16, #tpu.memory_space<vmem>>, vector<16x64xbf16>
    %c32 = arith.constant 32 : index
    %c0_4 = arith.constant 0 : index
    %3 = vector.load %arg3[%c32, %c0_4] : memref<97x64xbf16, #tpu.memory_space<vmem>>, vector<64x64xbf16>
    %c96 = arith.constant 96 : index
    %c0_5 = arith.constant 0 : index
    %4 = vector.load %arg3[%c96, %c0_5] : memref<97x64xbf16, #tpu.memory_space<vmem>>, vector<1x64xbf16>
    %c0_6 = arith.constant 0 : index
    %c0_7 = arith.constant 0 : index
    %5 = vector.load %arg1[%c0_6, %c0_7] : memref<8x16xf32, #tpu.memory_space<vmem>>, vector<8x16xf32>
    %6 = arith.truncf %5 : vector<8x16xf32> to vector<8x16xbf16>
    %cst = arith.constant dense<0.000000e+00> : vector<8x64xf32>
    %7 = tpu.matmul %6, %1, %cst {dimension_numbers = #tpu.dot_dimension_numbers<[1], [0], [0], [1], [0, 0, 1, 1], [], []>} : vector<8x16xbf16>, vector<16x64xbf16>, vector<8x64xf32> -> vector<8x64xf32>
    %c0_8 = arith.constant 0 : index
    %c0_9 = arith.constant 0 : index
    %8 = vector.load %arg2[%c0_8, %c0_9] : memref<8x16xf32, #tpu.memory_space<vmem>>, vector<8x16xf32>
    %9 = arith.truncf %8 : vector<8x16xf32> to vector<8x16xbf16>
    %cst_10 = arith.constant dense<0.000000e+00> : vector<8x64xf32>
    %10 = tpu.matmul %9, %2, %cst_10 {dimension_numbers = #tpu.dot_dimension_numbers<[1], [0], [0], [1], [0, 0, 1, 1], [], []>} : vector<8x16xbf16>, vector<16x64xbf16>, vector<8x64xf32> -> vector<8x64xf32>
    %11 = arith.addf %7, %10 : vector<8x64xf32>
    %12 = vector.extract_strided_slice %0 {offsets = [0, 0], sizes = [1, 64], strides = [1, 1]} : vector<3x64xf32> to vector<1x64xf32>
    %13 = vector.broadcast %12 : vector<1x64xf32> to vector<8x64xf32>
    %14 = arith.addf %11, %13 : vector<8x64xf32>
    %cst_11 = arith.constant 0.000000e+00 : f32
    %15 = vector.broadcast %cst_11 : f32 to vector<8x64xf32>
    %16 = arith.cmpf ogt, %14, %15 : vector<8x64xf32>
    %cst_12 = arith.constant 0.00999999977 : f32
    %17 = vector.broadcast %cst_12 : f32 to vector<8x64xf32>
    %18 = arith.mulf %17, %14 : vector<8x64xf32>
    %19 = arith.select %16, %14, %18 : vector<8x64xi1>, vector<8x64xf32>
    %20 = arith.truncf %19 : vector<8x64xf32> to vector<8x64xbf16>
    %cst_13 = arith.constant dense<0.000000e+00> : vector<8x64xf32>
    %21 = tpu.matmul %20, %3, %cst_13 {dimension_numbers = #tpu.dot_dimension_numbers<[1], [0], [0], [1], [0, 0, 1, 1], [], []>} : vector<8x64xbf16>, vector<64x64xbf16>, vector<8x64xf32> -> vector<8x64xf32>
    %22 = vector.extract_strided_slice %0 {offsets = [1, 0], sizes = [1, 64], strides = [1, 1]} : vector<3x64xf32> to vector<1x64xf32>
    %23 = vector.broadcast %22 : vector<1x64xf32> to vector<8x64xf32>
    %24 = arith.addf %21, %23 : vector<8x64xf32>
    %cst_14 = arith.constant 0.000000e+00 : f32
    %25 = vector.broadcast %cst_14 : f32 to vector<8x64xf32>
    %26 = arith.cmpf ogt, %24, %25 : vector<8x64xf32>
    %cst_15 = arith.constant 0.00999999977 : f32
    %27 = vector.broadcast %cst_15 : f32 to vector<8x64xf32>
    %28 = arith.mulf %27, %24 : vector<8x64xf32>
    %29 = arith.select %26, %24, %28 : vector<8x64xi1>, vector<8x64xf32>
    %30 = tpu.transpose %29, [1, 0] : vector<8x64xf32> -> vector<64x8xf32>
    %31 = arith.truncf %30 : vector<64x8xf32> to vector<64x8xbf16>
    %cst_16 = arith.constant dense<0.000000e+00> : vector<1x8xf32>
    %32 = tpu.matmul %4, %31, %cst_16 {dimension_numbers = #tpu.dot_dimension_numbers<[1], [0], [0], [1], [0, 0, 1, 1], [], []>} : vector<1x64xbf16>, vector<64x8xbf16>, vector<1x8xf32> -> vector<1x8xf32>
    %33 = vector.extract_strided_slice %0 {offsets = [2, 0], sizes = [1, 1], strides = [1, 1]} : vector<3x64xf32> to vector<1x1xf32>
    %34 = vector.broadcast %33 : vector<1x1xf32> to vector<1x8xf32>
    %35 = arith.addf %32, %34 : vector<1x8xf32>
    %c0_17 = arith.constant 0 : index
    %c0_18 = arith.constant 0 : index
    %36 = vector.load %arg5[%c0_17, %c0_18] : memref<1x8xf32, #tpu.memory_space<vmem>>, vector<1x8xf32>
    tpu.vector_store %arg5[%c0_17, %c0_18], %35 {strides = array<i32>} : memref<1x8xf32, #tpu.memory_space<vmem>>, vector<1x8xf32>,
    return
  }
  func.func @transform_0(%arg0: i32) -> (i32, i32) {
    %c0_i32 = arith.constant 0 : i32
    %c0_i32_0 = arith.constant 0 : i32
    return %arg0, %c0_i32 : i32, i32
  }
  func.func @transform_1(%arg0: i32) -> (i32, i32) {
    %c0_i32 = arith.constant 0 : i32
    %c0_i32_0 = arith.constant 0 : i32
    return %arg0, %c0_i32 : i32, i32
  }
  func.func @transform_2(%arg0: i32) -> (i32, i32) {
    %c0_i32 = arith.constant 0 : i32
    %c0_i32_0 = arith.constant 0 : i32
    %c0_i32_1 = arith.constant 0 : i32
    return %c0_i32, %c0_i32_0 : i32, i32
  }
  func.func @transform_3(%arg0: i32) -> (i32, i32) {
    %c0_i32 = arith.constant 0 : i32
    %c0_i32_0 = arith.constant 0 : i32
    %c0_i32_1 = arith.constant 0 : i32
    return %c0_i32, %c0_i32_0 : i32, i32
  }
  func.func @transform_4(%arg0: i32) -> (i32, i32) {
    %c0_i32 = arith.constant 0 : i32
    %c0_i32_0 = arith.constant 0 : i32
    return %c0_i32, %arg0 : i32, i32
  }
}

</mosaic_0001>

<bundles_post_ra>
// kernel: tpu_custom_call.1
= control target key start
LH: loop header
LB: loop body
LE: loop exit
PB: predicated region body
PF: predicated region fallthrough
CT: control target
= control target key end

     0   :  { %v416_v1 = vmov 0.0   ;;  %vm417_vm0 = vmmov 0   ;;  %vm43_vm1 = vcmask 130048   ;;  %s507_s0 = inlined_call_operand.vmem [shape: f32[8,16], index: 0, kind: input, shape index: {}]   ;;  %s508_s1 = inlined_call_operand.vmem [shape: f32[8,16], index: 1, kind: input, shape index: {}]   ;;  %s509_s2 = inlined_call_operand.vmem [shape: bf16[97,64], index: 2, kind: input, shape index: {}]   ;;  %s510_s3 = inlined_call_operand.vmem [shape: f32[3,64], index: 3, kind: input, shape index: {}]   ;;  %s511_s4 = inlined_call_operand.hbm [shape: f32[1,8], index: 4, kind: output, shape index: {}]  }
   0x1   :  { %v386_v0 = vld [vmem:[%s509_s2 + $0x8] sm:$0xff]   ;;  %345 = vmatprep.subr.bf16.mxu0 %v416_v1  ;;  %351 = vmatprep.subr.bf16.mxu1 %v416_v1  ;;  %v387_v2 = vld [vmem:[%s509_s2] sm:$0xff]   ;;  %v388_v7 = vld [vmem:[%s509_s2 + $0x10] sm:$0xff]  }
   0x2   :  { %346 = vmatpush3.bf16.msra.mxu0 %v386_v0  ;;  %347 = vmatprep.mubr.msk.bf16.mxu0 %vm417_vm0, %v416_v1  ;;  %v35_v3 = vld [vmem:[%s508_s1] sm:$0xff]  ;;  %v389_v8 = vld [vmem:[%s509_s2 + $0x18] sm:$0xff]  }
   0x3   :  { %v33_v4 = vld [vmem:[%s507_s0] sm:$0xff]  ;;  %352 = vmatpush3.bf16.msra.mxu1 %v387_v2  ;;  %353 = vmatprep.mubr.msk.bf16.mxu1 %vm417_vm0, %v416_v1  ;;  %v36_v5 = vpack.c.bf16 %v35_v3, %v35_v3 }
   0x4   :  { %v34_v6 = vpack.c.bf16 %v33_v4, %v33_v4  ;;  %357 = vmatprep.subr.bf16.mxu0 %v416_v1  ;;  %369 = vmatprep.subr.bf16.mxu1 %v416_v1 }
   0x5   :  { %348 = vmatmul.mubr.msk.bf16.vlgmr.msra.gmra.mrb[0].mxu0 %vm43_vm1, %v36_v5 }
   0x6   :  { %354 = vmatmul.mubr.msk.bf16.vlgmr.msra.gmra.mrb[0].mxu1 %vm43_vm1, %v34_v6  ;;  %358 = vmatpush3.bf16.msra.mxu0 %v388_v7 }
   0x7   :  { %9 = vsyncpa [#allocation3], 0  ;;  %359 = vmatprep.subr.bf16.mxu0 %v416_v1  ;;  %365 = vmatprep.mubr.msk.bf16.mxu0 %vm417_vm0, %v416_v1  ;;  %v390_v9 = vld [vmem:[%s509_s2 + $0x20] sm:$0xff]   ;;  %v391_v10 = vld [vmem:[%s509_s2 + $0x28] sm:$0xff]   ;;  %v136_v11 = vlaneseq  ;;  %vm173_vm3 = vcmask 523264   ;;  %v418_v38 = vmov 0  }
   0x8   :  { %377 = vmatprep.mubr.msk.bf16.mxu1 %vm417_vm0, %v416_v1  ;;  %v19_v14 = vld [vmem:[%s510_s3] sm:$0x7]  ;;  %v32_v51 = vld [vmem:[%s509_s2 + $0x30] sm:$0x1]  ;;  %s419_s6 = smov [#allocation2]   ;;  %vm305_vm5 = vcmask 57344  }
   0x9   :  { %v137_v12 = vshrl.u32 %v136_v11, 7  ;;  %s313_s7 = sshll.u32 %s419_s6, 4  ;;  %s314_s7 = int_to_ptr.vmem [resolvable:$true] %s313_s7 }
   0xa   :  { %360 = vmatpush3.bf16.msra.mxu0 %v389_v8  ;;  %s392_s8 = scalar_lea.vmem %s314_s7, 16  ;;  %s396_s9 = scalar_lea.vmem %s314_s7, 32 }
   0xb   :  { %361 = vmatprep.subr.bf16.mxu0 %v416_v1  ;;  %v138_v13 = vsub.s32 0, %v137_v12  ;;  %v147_v29 = vsub.s32 1, %v137_v12  ;;  %p393_p0 = scmp.ne.s32.totalorder %s314_s7, %s392_s8  ;;  %p397_p1 = scmp.lt.s32.totalorder %s314_s7, %s314_s7 }
   0xc   :  { %p398_p2 = scmp.lt.s32.totalorder %s396_s9, %s392_s8 }
   0xd   :  { %v139_v16 = vrot.slane %v19_v14, %v138_v13  ;;  %v148_v30 = vrot.slane %v19_v14, %v147_v29 }
   0xe   :  { %362 = vmatpush3.bf16.msra.mxu0 %v390_v9  ;;  %p399_p3 = por %p398_p2, %p397_p1 }
   0xf   :  { %363 = vmatprep.subr.bf16.mxu0 %v416_v1 }
  0x10   :  { %p400_p4 = pnand %p399_p3, %p393_p0 }
  0x12   :  { %364 = vmatpush3.bf16.msra.mxu0 %v391_v10 }
  0xd8   :  { %v81_v15 = vpop.f32.mrb[0].mxu0 }
  0xd9   :  { %v130_v17 = vpop.f32.mrb[0].mxu1  ;;  %v349_v18 = vpop.f32.mrb[1].mxu0 }
  0xda   :  { %v131_v19 = vadd.f32 %v130_v17, %v81_v15  ;;  %v355_v20 = vpop.f32.mrb[1].mxu1  ;;  %v84_v21 = vpop.f32.mrb[2].mxu0 }
  0xdb   :  { %v133_v22 = vpop.f32.mrb[2].mxu1  ;;  %v350_v23 = vpop.f32.mrb[3].mxu0 }
  0xdc   :  { %v140_v24 = vadd.f32 %v139_v16, %v131_v19  ;;  %v356_v25 = vpop.f32.mrb[3].mxu1 }
  0xde   :  { %vm141_vm2 = vcmp.gt.f32.partialorder %v140_v24, 0.0  ;;  %v142_v26 = vmul.f32 0.01, %v140_v24 }
  0xe0   :  { %v143_v27 = vsel %vm141_vm2, %v140_v24, %v142_v26 }
  0xe1   :  { %v144_v28 = vpack.c.bf16 %v143_v27, %v143_v27 }
  0xe3   :  { %366 = vmatmul.mubr.msk.bf16.vlgmr.msra.gmra.mrb[4].mxu0 %vm173_vm3, %v144_v28 }
 0x1b6   :  { %v211_v31 = vpop.f32.mrb[4].mxu0 }
 0x1b7   :  { %v212_v32 = vadd.f32 %v211_v31, %v148_v30  ;;  %v367_v33 = vpop.f32.mrb[5].mxu0 }
 0x1b8   :  { %v214_v34 = vpop.f32.mrb[6].mxu0 }
 0x1b9   :  { %v368_v35 = vpop.f32.mrb[7].mxu0  ;;  %vm217_vm4 = vcmp.gt.f32.partialorder %v212_v32, 0.0  ;;  %v218_v36 = vmul.f32 0.01, %v212_v32 }
 0x1bb   :  { %v219_v37 = vsel %vm217_vm4, %v212_v32, %v218_v36 }
 0x1bc   :  { %220 = vxpose.xlu0.b32.start.end [1/1] (short) (narrow) %v219_v37, 64 }
 0x1e5   :  { %385 = vset.pattern.permute.xlu0 %v418_v38 }
 0x201   :  { %258 = vperm.xlu0 %385, %v19_v14  }
 0x23c   :  { %v236_v39 = vpop.trf.xlu0 }
 0x240   :  { %v237_v40 = vpop.trf.xlu0 }
 0x241   :  { %v252_v41 = vpack.c.bf16 %v237_v40, %v236_v39 }
 0x243   :  { %370 = vmatpush3.bf16.msra.mxu1 %v252_v41 }
 0x244   :  { %v238_v42 = vpop.trf.xlu0  ;;  %371 = vmatprep.subr.bf16.mxu1 %v416_v1 }
 0x248   :  { %v239_v43 = vpop.trf.xlu0 }
 0x249   :  { %v253_v44 = vpack.c.bf16 %v239_v43, %v238_v42 }
 0x24b   :  { %372 = vmatpush3.bf16.msra.mxu1 %v253_v44 }
 0x24c   :  { %v240_v45 = vpop.trf.xlu0  ;;  %373 = vmatprep.subr.bf16.mxu1 %v416_v1 }
 0x250   :  { %v241_v46 = vpop.trf.xlu0 }
 0x251   :  { %v254_v47 = vpack.c.bf16 %v241_v46, %v240_v45 }
 0x253   :  { %374 = vmatpush3.bf16.msra.mxu1 %v254_v47 }
 0x254   :  { %v242_v48 = vpop.trf.xlu0  ;;  %375 = vmatprep.subr.bf16.mxu1 %v416_v1 }
 0x258   :  { %v243_v49 = vpop.trf.xlu0 }
 0x259   :  { %v255_v50 = vpack.c.bf16 %v243_v49, %v242_v48 }
 0x25b   :  { %376 = vmatpush3.bf16.msra.mxu1 %v255_v50 }
 0x25e   :  { %378 = vmatmul.mubr.msk.bf16.vlgmr.msra.gmra.mrb[4].mxu1 %vm173_vm3, %v32_v51 }
 0x280   :  { %v259_v52 = vpop.permute.xlu0 %258 }
 0x281   :  { %v260_v53 = vrot.slane %v259_v52, 2 }
 0x331   :  { %v299_v54 = vpop.f32.mrb[4].mxu1 }
 0x332   :  { %v300_v55 = vadd.f32 %v299_v54, %v260_v53  ;;  %v379_v56 = vpop.f32.mrb[5].mxu1 }
 0x333   :  { %v302_v57 = vpop.f32.mrb[6].mxu1 }
 0x334   :  { %v380_v58 = vpop.f32.mrb[7].mxu1  ;;  %306 = vst.msk [vmem:[#allocation2] sm:$0x1] %vm305_vm5, %v300_v55 }
 0x335   :  { %403 = shalt.err (!%p400_p4)
}
 0x336   :  { %s404_s11 = scalar_lea.hbm %s511_s4, 16 }
 0x337   :  { %p405_p5 = scmp.ne.s32.totalorder %s511_s4, %s404_s11  ;;  %p408_p6 = scmp.lt.u32.totalorder %s404_s11, %s511_s4 }
 0x339   :  { %p410_p7 = pnand %p408_p6, %p405_p5 }
 0x33b   :  { %413 = shalt.err (!%p410_p7)
}
 0x33c   :  { %316 = dma.vmem_to_hbm [thread:$0]  %s314_s7, 16, %s511_s4, [#allocation3]  }
 0x33d   :  { %414 = dma.done.wait [#allocation3], 16  }
 0x33e   :  { %415 = vsyncadd [#allocation3], 4294967280 }
 0x33f   :  { %320 = vsyncpa [#allocation3], 1 }

</bundles_post_ra>
